<compile_context>
chip_gen: v7x
topology: tpu7x:2x2x1
jax: 0.10.0
libtpu: 0.0.40
codegen_flags: <defaults>
</compile_context>

<pallas_src>
import functools

import jax
import jax.numpy as jnp
from jax import lax
from jax.experimental import pallas as pl
from jax.experimental.pallas import tpu as pltpu


def _round_up(x, m):
    return ((x + m - 1) // m) * m


def _gelu_f32(h, approx):
    if approx:
        # tanh approximation: transcendental goes to the (otherwise idle) EUP.
        c = 0.7978845608028654
        return 0.5 * h * (1.0 + jnp.tanh(c * (h + 0.044715 * h * h * h)))
    # exact erf gelu, matching transformers.get_activation('gelu')
    return 0.5 * h * (1.0 + lax.erf(h * 0.7071067811865476))


def _block_spec(shape, index_map, buffer_count=None):
    """BlockSpec helper; requests an explicit pipeline depth when supported."""
    if buffer_count is None:
        return pl.BlockSpec(shape, index_map)
    try:
        return pl.BlockSpec(shape, index_map, pipeline_mode=pl.Buffered(buffer_count))
    except (TypeError, ValueError):
        return pl.BlockSpec(shape, index_map)


# ----------------------------------------------------------------------------
# Kernels
# ----------------------------------------------------------------------------
def _resident_kernel(x_ref, wt_ref, g_ref, b_ref, o_ref, *, eps, inv_e, approx_gelu):
    """Single pass: row tile against the full resident [H, Ep] weight."""
    h = lax.dot_general(
        x_ref[...], wt_ref[...],
        dimension_numbers=(((1,), (0,)), ((), ())),
        preferred_element_type=jnp.float32)
    h = _gelu_f32(h, approx_gelu)

    # Fused two-moment LayerNorm over the vocab axis (single pass over h).
    s1 = jnp.sum(h, axis=-1, keepdims=True)
    s2 = jnp.sum(h * h, axis=-1, keepdims=True)
    mean = s1 * inv_e
    var = jnp.maximum(s2 * inv_e - mean * mean, 0.0)   # guard f32 cancellation
    normed = (h - mean) * lax.rsqrt(var + eps)
    out = normed * g_ref[...].astype(jnp.float32) + b_ref[...].astype(jnp.float32)
    o_ref[...] = out.astype(o_ref.dtype)


def _tiled_kernel(x_ref, wt_ref, g_ref, b_ref, o_ref, s1_ref, s2_ref, *,
                  eps, inv_e, approx_gelu):
    """Vocab-tiled two-pass path.

    Grid = (row_tiles, 2, vocab_tiles).  Pass p==0 streams the weight tiles
    and accumulates s1/s2 per row tile in VMEM scratch; pass p==1 recomputes
    matmul+gelu per tile (cheap for generator-sized H) and normalizes.
    """
    p = pl.program_id(1)
    j = pl.program_id(2)

    @pl.when((p == 0) & (j == 0))
    def _init():
        s1_ref[...] = jnp.zeros_like(s1_ref)
        s2_ref[...] = jnp.zeros_like(s2_ref)

    h = lax.dot_general(
        x_ref[...], wt_ref[...],
        dimension_numbers=(((1,), (0,)), ((), ())),
        preferred_element_type=jnp.float32)
    h = _gelu_f32(h, approx_gelu)

    @pl.when(p == 0)
    def _accumulate():
        s1_ref[...] += jnp.sum(h, axis=-1, keepdims=True)
        s2_ref[...] += jnp.sum(h * h, axis=-1, keepdims=True)

    @pl.when(p == 1)
    def _normalize():
        mean = s1_ref[...] * inv_e
        var = jnp.maximum(s2_ref[...] * inv_e - mean * mean, 0.0)
        rstd = lax.rsqrt(var + eps)
        out = ((h - mean) * rstd * g_ref[...].astype(jnp.float32)
               + b_ref[...].astype(jnp.float32))
        o_ref[...] = out.astype(o_ref.dtype)


# ----------------------------------------------------------------------------
# Wrapper
# ----------------------------------------------------------------------------
def tied_electra_generator_predictions(hidden_states, embedding_weights,
                                       ln_gamma, ln_beta, *,
                                       eps=1e-12, tm=None, tn=None,
                                       matmul_dtype=None, approx_gelu=False):
    """hidden_states [B,S,H], embedding_weights [E,H], ln_gamma/ln_beta [E].
    Returns [B,S,E] in hidden_states.dtype (f32 accumulation / LayerNorm math).

    matmul_dtype: optionally cast the matmul operands (e.g. jnp.bfloat16) for
    ~3-6x faster MXU and half the weight VMEM/HBM footprint at reduced operand
    precision (accumulation stays f32).  Default keeps the native dtype.
    """
    B, S, H = hidden_states.shape
    E, H2 = embedding_weights.shape
    assert H == H2
    M = B * S
    out_dtype = hidden_states.dtype

    try:
        vmem_cap = int(pltpu.get_tpu_info().vmem_capacity_bytes)
    except Exception:
        vmem_cap = 64 * 1024 * 1024   # v7x-safe fallback

    x2d = hidden_states.reshape(M, H)
    w = embedding_weights
    if matmul_dtype is not None:
        x2d = x2d.astype(matmul_dtype)
        w = w.astype(matmul_dtype)

    xb = jnp.dtype(x2d.dtype).itemsize
    wb = jnp.dtype(w.dtype).itemsize
    ob = jnp.dtype(out_dtype).itemsize

    # Generation-aware row tile (smaller default on 64 MiB/TC parts).
    if tm is None:
        tm = 128 if vmem_cap <= 96 * 1024 * 1024 else 256
    tm = min(tm, M)
    if tm < M:
        tm = max(8, (tm // 8) * 8)

    # ---- choose resident single-pass vs vocab-tiled two-pass path ----------
    E128 = _round_up(E, 128)
    resident_need = (E128 * H * wb            # single-buffered [H,E] weight
                     + 2 * tm * H * xb        # double-buffered x tile
                     + 2 * tm * E128 * ob     # double-buffered output tile
                     + tm * E128 * 4          # f32 gelu/LN intermediate
                     + 4 * E128 * 4)          # gamma / beta
    use_tiled = (tn is not None and tn < E128) or resident_need > 0.7 * vmem_cap

    if use_tiled:
        if tn is None:
            tn = 1024
        tn = min(_round_up(tn, 128), E128)

        def _tiled_need(tm_, tn_):
            return (2 * tm_ * H * xb + 2 * H * tn_ * wb + 2 * tm_ * tn_ * ob
                    + tm_ * tn_ * 4 + 4 * tn_ * 4 + 8 * tm_ * 4)

        # Auto-retile instead of silently overshooting the VMEM cap.
        while _tiled_need(tm, tn) > 0.8 * vmem_cap and (tn > 128 or tm > 8):
            if tn > 128:
                tn //= 2
            else:
                tm //= 2
        Ep = _round_up(E, tn)
        need = _tiled_need(tm, tn)
    else:
        tn = E128
        Ep = E128
        need = resident_need

    vmem_limit = int(min(0.9 * vmem_cap, max(2 * need, 32 * 1024 * 1024)))
    assert need <= vmem_limit, (
        f"VMEM working set {need} B exceeds limit {vmem_limit} B; shrink tm/tn")

    # Zero-pad the vocab to a lane/tile multiple.  The padded weight rows are
    # exactly zero, so gelu(0)=0 contributes nothing to the LN moments; inv_e
    # stays 1/true_E and the padded output columns are sliced off below.
    if Ep != E:
        w = jnp.pad(w, ((0, Ep - E), (0, 0)))
        gamma = jnp.pad(ln_gamma, (0, Ep - E))
        beta = jnp.pad(ln_beta, (0, Ep - E))
    else:
        gamma, beta = ln_gamma, ln_beta
    wt = w.T                        # [H, Ep]: MXU-native stationary RHS layout
    gamma2d = gamma.reshape(1, Ep)
    beta2d = beta.reshape(1, Ep)

    n_row = pl.cdiv(M, tm)
    common = dict(eps=float(eps), inv_e=1.0 / float(E), approx_gelu=approx_gelu)

    if not use_tiled:
        cost = pl.CostEstimate(
            flops=2 * M * Ep * H,
            transcendentals=M * Ep,
            bytes_accessed=M * H * xb + Ep * H * wb + M * Ep * ob + 2 * Ep * 4)

        def _resident_call(invariant_buffer_count):
            return pl.pallas_call(
                functools.partial(_resident_kernel, **common),
                out_shape=jax.ShapeDtypeStruct((M, Ep), out_dtype),
                grid_spec=pltpu.PrefetchScalarGridSpec(
                    num_scalar_prefetch=0,
                    grid=(n_row,),
                    in_specs=[
                        _block_spec((tm, H), lambda i: (i, 0)),
                        # grid-invariant operands: single-buffered
                        _block_spec((H, Ep), lambda i: (0, 0), invariant_buffer_count),
                        _block_spec((1, Ep), lambda i: (0, 0), invariant_buffer_count),
                        _block_spec((1, Ep), lambda i: (0, 0), invariant_buffer_count),
                    ],
                    out_specs=pl.BlockSpec((tm, Ep), lambda i: (i, 0)),
                ),
                compiler_params=pltpu.CompilerParams(
                    dimension_semantics=("parallel",),
                    vmem_limit_bytes=vmem_limit),
                cost_estimate=cost,
            )(x2d, wt, gamma2d, beta2d)

        try:
            out2d = _resident_call(1)
        except Exception:
            # Fallback if this Pallas build rejects the pl.Buffered(1) hint.
            out2d = _resident_call(None)
    else:
        n_e = Ep // tn
        cost = pl.CostEstimate(
            flops=4 * M * Ep * H,                      # matmul recomputed in pass 1
            transcendentals=2 * M * Ep,
            bytes_accessed=(M * H * xb + 2 * n_row * Ep * H * wb
                            + M * Ep * ob + 2 * Ep * 4))
        out2d = pl.pallas_call(
            functools.partial(_tiled_kernel, **common),
            out_shape=jax.ShapeDtypeStruct((M, Ep), out_dtype),
            grid_spec=pltpu.PrefetchScalarGridSpec(
                num_scalar_prefetch=0,
                grid=(n_row, 2, n_e),       # rows | pass (moments / normalize) | vocab tiles
                in_specs=[
                    _block_spec((tm, H), lambda i, p, j: (i, 0)),
                    _block_spec((H, tn), lambda i, p, j: (0, j)),
                    _block_spec((1, tn), lambda i, p, j: (0, j)),
                    _block_spec((1, tn), lambda i, p, j: (0, j)),
                ],
                # Output block stays parked at (i, 0) during the moment pass
                # (p == 0) so nothing is written back until pass 1 fills it.
                out_specs=pl.BlockSpec((tm, tn), lambda i, p, j: (i, j * p)),
                scratch_shapes=[pltpu.VMEM((tm, 1), jnp.float32),
                                pltpu.VMEM((tm, 1), jnp.float32)],
            ),
            compiler_params=pltpu.CompilerParams(
                dimension_semantics=("parallel", "arbitrary", "arbitrary"),
                vmem_limit_bytes=vmem_limit),
            cost_estimate=cost,
        )(x2d, wt, gamma2d, beta2d)

    return out2d[:, :E].reshape(B, S, E)


# ----------------------------------------------------------------------------
# Reference + self-test
# ----------------------------------------------------------------------------
def _reference(hidden_states, embedding_weights, ln_gamma, ln_beta, eps=1e-12):
    h = jnp.einsum('bsh,eh->bse', hidden_states.astype(jnp.float32),
                   embedding_weights.astype(jnp.float32))
    h = 0.5 * h * (1.0 + lax.erf(h / jnp.sqrt(2.0)))
    mean = jnp.mean(h, axis=-1, keepdims=True)
    var = jnp.mean((h - mean) ** 2, axis=-1, keepdims=True)
    h = (h - mean) * lax.rsqrt(var + eps)
    return h * ln_gamma + ln_beta


if __name__ == "__main__":
    eps = 1e-12
    key = jax.random.PRNGKey(0)
    k1, k2, k3, k4, k5, k6 = jax.random.split(key, 6)

    # --- case 1: small shapes -> resident-weight single-pass path ----------
    B, S, H, E = 2, 8, 32, 128
    hs = jax.random.normal(k1, (B, S, H), jnp.float32)
    wemb = jax.random.normal(k2, (E, H), jnp.float32) * 0.05
    gamma = jnp.ones((E,), jnp.float32) + 0.1 * jax.random.normal(k3, (E,), jnp.float32)
    beta = 0.1 * jax.random.normal(k4, (E,), jnp.float32)

    out = tied_electra_generator_predictions(hs, wemb, gamma, beta, eps=eps)
    out = jax.block_until_ready(out)
    ref = _reference(hs, wemb, gamma, beta, eps=eps)
    assert out.shape == (B, S, E)
    assert jnp.allclose(out, ref, atol=1e-4, rtol=1e-4), \
        f"resident path max abs err {jnp.max(jnp.abs(out - ref))}"

    # --- case 2: force the vocab-tiled two-pass path (non-128-multiple E,
    #             ragged last row tile, zero-padded vocab columns) ----------
    B2, S2, H2, E2 = 2, 7, 32, 200
    hs2 = jax.random.normal(k5, (B2, S2, H2), jnp.float32)
    wemb2 = jax.random.normal(k6, (E2, H2), jnp.float32) * 0.05
    gamma2 = jnp.ones((E2,), jnp.float32)
    beta2 = jnp.zeros((E2,), jnp.float32)

    out2 = tied_electra_generator_predictions(hs2, wemb2, gamma2, beta2,
                                              eps=eps, tm=8, tn=128)
    out2 = jax.block_until_ready(out2)
    ref2 = _reference(hs2, wemb2, gamma2, beta2, eps=eps)
    assert out2.shape == (B2, S2, E2)
    assert jnp.allclose(out2, ref2, atol=1e-4, rtol=1e-4), \
        f"tiled path max abs err {jnp.max(jnp.abs(out2 - ref2))}"

    print("KERNEL_OK")
</pallas_src>

<mosaic_0001>
module attributes {stable_mosaic.version = 11 : i64} {
  func.func @_resident_kernel(%arg0: i32, %arg1: memref<16x32xf32, #tpu.memory_space<vmem>>, %arg2: memref<32x128xf32, #tpu.memory_space<vmem>>, %arg3: memref<1x128xf32, #tpu.memory_space<vmem>>, %arg4: memref<1x128xf32, #tpu.memory_space<vmem>>, %arg5: memref<16x128xf32, #tpu.memory_space<vmem>>) attributes {dimension_semantics = [#tpu.dimension_semantics<parallel>], iteration_bounds = array<i64: 1>, scalar_prefetch = 0 : i64, scratch_operands = 0 : i64, tpu.core_type = #tpu.core_type<tc>, window_params = [{transform_indices = @transform_0, window_bounds = array<i64: 16, 32>}, {pipeline_mode = #tpu.pipeline_mode<synchronous>, transform_indices = @transform_1, window_bounds = array<i64: 32, 128>}, {pipeline_mode = #tpu.pipeline_mode<synchronous>, transform_indices = @transform_2, window_bounds = array<i64: 1, 128>}, {pipeline_mode = #tpu.pipeline_mode<synchronous>, transform_indices = @transform_3, window_bounds = array<i64: 1, 128>}, {transform_indices = @transform_4, window_bounds = array<i64: 16, 128>}]} {
    %c0 = arith.constant 0 : index
    %c0_0 = arith.constant 0 : index
    %0 = vector.load %arg1[%c0, %c0_0] : memref<16x32xf32, #tpu.memory_space<vmem>>, vector<16x32xf32>
    %c0_1 = arith.constant 0 : index
    %c0_2 = arith.constant 0 : index
    %1 = vector.load %arg2[%c0_1, %c0_2] : memref<32x128xf32, #tpu.memory_space<vmem>>, vector<32x128xf32>
    %cst = arith.constant dense<0.000000e+00> : vector<16x128xf32>
    %2 = tpu.matmul %0, %1, %cst {dimension_numbers = #tpu.dot_dimension_numbers<[1], [0], [0], [1], [0, 0, 1, 1], [], []>} : vector<16x32xf32>, vector<32x128xf32>, vector<16x128xf32> -> vector<16x128xf32>
    %cst_3 = arith.constant 5.000000e-01 : f32
    %3 = vector.broadcast %cst_3 : f32 to vector<16x128xf32>
    %4 = arith.mulf %3, %2 : vector<16x128xf32>
    %cst_4 = arith.constant 0.707106769 : f32
    %5 = vector.broadcast %cst_4 : f32 to vector<16x128xf32>
    %6 = arith.mulf %2, %5 : vector<16x128xf32>
    %7 = math.erf %6 : vector<16x128xf32>
    %cst_5 = arith.constant 1.000000e+00 : f32
    %8 = vector.broadcast %cst_5 : f32 to vector<16x128xf32>
    %9 = arith.addf %8, %7 : vector<16x128xf32>
    %10 = arith.mulf %4, %9 : vector<16x128xf32>
    %cst_6 = arith.constant dense<0.000000e+00> : vector<16xf32>
    %11 = vector.multi_reduction <add>, %10, %cst_6 [1] : vector<16x128xf32> to vector<16xf32>
    %12 = vector.shape_cast %11 : vector<16xf32> to vector<16x1xf32>
    %13 = arith.mulf %10, %10 : vector<16x128xf32>
    %cst_7 = arith.constant dense<0.000000e+00> : vector<16xf32>
    %14 = vector.multi_reduction <add>, %13, %cst_7 [1] : vector<16x128xf32> to vector<16xf32>
    %15 = vector.shape_cast %14 : vector<16xf32> to vector<16x1xf32>
    %cst_8 = arith.constant 7.812500e-03 : f32
    %16 = vector.broadcast %cst_8 : f32 to vector<16x1xf32>
    %17 = arith.mulf %12, %16 : vector<16x1xf32>
    %cst_9 = arith.constant 7.812500e-03 : f32
    %18 = vector.broadcast %cst_9 : f32 to vector<16x1xf32>
    %19 = arith.mulf %15, %18 : vector<16x1xf32>
    %20 = arith.mulf %17, %17 : vector<16x1xf32>
    %21 = arith.subf %19, %20 : vector<16x1xf32>
    %cst_10 = arith.constant 0.000000e+00 : f32
    %22 = vector.broadcast %cst_10 : f32 to vector<16x1xf32>
    %23 = arith.maximumf %21, %22 : vector<16x1xf32>
    %24 = vector.broadcast %17 : vector<16x1xf32> to vector<16x128xf32>
    %25 = arith.subf %10, %24 : vector<16x128xf32>
    %cst_11 = arith.constant 9.99999996E-13 : f32
    %26 = vector.broadcast %cst_11 : f32 to vector<16x1xf32>
    %27 = arith.addf %23, %26 : vector<16x1xf32>
    %28 = math.rsqrt %27 : vector<16x1xf32>
    %29 = vector.broadcast %28 : vector<16x1xf32> to vector<16x128xf32>
    %30 = arith.mulf %25, %29 : vector<16x128xf32>
    %c0_12 = arith.constant 0 : index
    %c0_13 = arith.constant 0 : index
    %31 = vector.load %arg3[%c0_12, %c0_13] : memref<1x128xf32, #tpu.memory_space<vmem>>, vector<1x128xf32>
    %32 = vector.broadcast %31 : vector<1x128xf32> to vector<16x128xf32>
    %33 = arith.mulf %30, %32 : vector<16x128xf32>
    %c0_14 = arith.constant 0 : index
    %c0_15 = arith.constant 0 : index
    %34 = vector.load %arg4[%c0_14, %c0_15] : memref<1x128xf32, #tpu.memory_space<vmem>>, vector<1x128xf32>
    %35 = vector.broadcast %34 : vector<1x128xf32> to vector<16x128xf32>
    %36 = arith.addf %33, %35 : vector<16x128xf32>
    %c0_16 = arith.constant 0 : index
    %c0_17 = arith.constant 0 : index
    %37 = vector.load %arg5[%c0_16, %c0_17] : memref<16x128xf32, #tpu.memory_space<vmem>>, vector<16x128xf32>
    tpu.vector_store %arg5[%c0_16, %c0_17], %36 {strides = array<i32>} : memref<16x128xf32, #tpu.memory_space<vmem>>, vector<16x128xf32>,
    return
  }
  func.func @transform_0(%arg0: i32) -> (i32, i32) {
    %c0_i32 = arith.constant 0 : i32
    %c0_i32_0 = arith.constant 0 : i32
    return %arg0, %c0_i32 : i32, i32
  }
  func.func @transform_1(%arg0: i32) -> (i32, i32) {
    %c0_i32 = arith.constant 0 : i32
    %c0_i32_0 = arith.constant 0 : i32
    %c0_i32_1 = arith.constant 0 : i32
    return %c0_i32, %c0_i32_0 : i32, i32
  }
  func.func @transform_2(%arg0: i32) -> (i32, i32) {
    %c0_i32 = arith.constant 0 : i32
    %c0_i32_0 = arith.constant 0 : i32
    %c0_i32_1 = arith.constant 0 : i32
    return %c0_i32, %c0_i32_0 : i32, i32
  }
  func.func @transform_3(%arg0: i32) -> (i32, i32) {
    %c0_i32 = arith.constant 0 : i32
    %c0_i32_0 = arith.constant 0 : i32
    %c0_i32_1 = arith.constant 0 : i32
    return %c0_i32, %c0_i32_0 : i32, i32
  }
  func.func @transform_4(%arg0: i32) -> (i32, i32) {
    %c0_i32 = arith.constant 0 : i32
    %c0_i32_0 = arith.constant 0 : i32
    return %arg0, %c0_i32 : i32, i32
  }
}

module attributes {stable_mosaic.version = 11 : i64} {
  func.func @_resident_kernel(%arg0: i32, %arg1: memref<16x32xf32, #tpu.memory_space<vmem>>, %arg2: memref<32x128xf32, #tpu.memory_space<vmem>>, %arg3: memref<1x128xf32, #tpu.memory_space<vmem>>, %arg4: memref<1x128xf32, #tpu.memory_space<vmem>>, %arg5: memref<16x128xf32, #tpu.memory_space<vmem>>) attributes {dimension_semantics = [#tpu.dimension_semantics<parallel>], iteration_bounds = array<i64: 1>, scalar_prefetch = 0 : i64, scratch_operands = 0 : i64, tpu.core_type = #tpu.core_type<tc>, window_params = [{transform_indices = @transform_0, window_bounds = array<i64: 16, 32>}, {pipeline_mode = #tpu.pipeline_mode<synchronous>, transform_indices = @transform_1, window_bounds = array<i64: 32, 128>}, {pipeline_mode = #tpu.pipeline_mode<synchronous>, transform_indices = @transform_2, window_bounds = array<i64: 1, 128>}, {pipeline_mode = #tpu.pipeline_mode<synchronous>, transform_indices = @transform_3, window_bounds = array<i64: 1, 128>}, {transform_indices = @transform_4, window_bounds = array<i64: 16, 128>}]} {
    %c0 = arith.constant 0 : index
    %c0_0 = arith.constant 0 : index
    %0 = vector.load %arg1[%c0, %c0_0] : memref<16x32xf32, #tpu.memory_space<vmem>>, vector<16x32xf32>
    %c0_1 = arith.constant 0 : index
    %c0_2 = arith.constant 0 : index
    %1 = vector.load %arg2[%c0_1, %c0_2] : memref<32x128xf32, #tpu.memory_space<vmem>>, vector<32x128xf32>
    %cst = arith.constant dense<0.000000e+00> : vector<16x128xf32>
    %2 = tpu.matmul %0, %1, %cst {dimension_numbers = #tpu.dot_dimension_numbers<[1], [0], [0], [1], [0, 0, 1, 1], [], []>} : vector<16x32xf32>, vector<32x128xf32>, vector<16x128xf32> -> vector<16x128xf32>
    %cst_3 = arith.constant 5.000000e-01 : f32
    %3 = vector.broadcast %cst_3 : f32 to vector<16x128xf32>
    %4 = arith.mulf %3, %2 : vector<16x128xf32>
    %cst_4 = arith.constant 0.707106769 : f32
    %5 = vector.broadcast %cst_4 : f32 to vector<16x128xf32>
    %6 = arith.mulf %2, %5 : vector<16x128xf32>
    %7 = math.erf %6 : vector<16x128xf32>
    %cst_5 = arith.constant 1.000000e+00 : f32
    %8 = vector.broadcast %cst_5 : f32 to vector<16x128xf32>
    %9 = arith.addf %8, %7 : vector<16x128xf32>
    %10 = arith.mulf %4, %9 : vector<16x128xf32>
    %cst_6 = arith.constant dense<0.000000e+00> : vector<16xf32>
    %11 = vector.multi_reduction <add>, %10, %cst_6 [1] : vector<16x128xf32> to vector<16xf32>
    %12 = vector.shape_cast %11 : vector<16xf32> to vector<16x1xf32>
    %13 = arith.mulf %10, %10 : vector<16x128xf32>
    %cst_7 = arith.constant dense<0.000000e+00> : vector<16xf32>
    %14 = vector.multi_reduction <add>, %13, %cst_7 [1] : vector<16x128xf32> to vector<16xf32>
    %15 = vector.shape_cast %14 : vector<16xf32> to vector<16x1xf32>
    %cst_8 = arith.constant 7.812500e-03 : f32
    %16 = vector.broadcast %cst_8 : f32 to vector<16x1xf32>
    %17 = arith.mulf %12, %16 : vector<16x1xf32>
    %cst_9 = arith.constant 7.812500e-03 : f32
    %18 = vector.broadcast %cst_9 : f32 to vector<16x1xf32>
    %19 = arith.mulf %15, %18 : vector<16x1xf32>
    %20 = arith.mulf %17, %17 : vector<16x1xf32>
    %21 = arith.subf %19, %20 : vector<16x1xf32>
    %cst_10 = arith.constant 0.000000e+00 : f32
    %22 = vector.broadcast %cst_10 : f32 to vector<16x1xf32>
    %23 = arith.maximumf %21, %22 : vector<16x1xf32>
    %24 = vector.broadcast %17 : vector<16x1xf32> to vector<16x128xf32>
    %25 = arith.subf %10, %24 : vector<16x128xf32>
    %cst_11 = arith.constant 9.99999996E-13 : f32
    %26 = vector.broadcast %cst_11 : f32 to vector<16x1xf32>
    %27 = arith.addf %23, %26 : vector<16x1xf32>
    %28 = math.rsqrt %27 : vector<16x1xf32>
    %29 = vector.broadcast %28 : vector<16x1xf32> to vector<16x128xf32>
    %30 = arith.mulf %25, %29 : vector<16x128xf32>
    %c0_12 = arith.constant 0 : index
    %c0_13 = arith.constant 0 : index
    %31 = vector.load %arg3[%c0_12, %c0_13] : memref<1x128xf32, #tpu.memory_space<vmem>>, vector<1x128xf32>
    %32 = vector.broadcast %31 : vector<1x128xf32> to vector<16x128xf32>
    %33 = arith.mulf %30, %32 : vector<16x128xf32>
    %c0_14 = arith.constant 0 : index
    %c0_15 = arith.constant 0 : index
    %34 = vector.load %arg4[%c0_14, %c0_15] : memref<1x128xf32, #tpu.memory_space<vmem>>, vector<1x128xf32>
    %35 = vector.broadcast %34 : vector<1x128xf32> to vector<16x128xf32>
    %36 = arith.addf %33, %35 : vector<16x128xf32>
    %c0_16 = arith.constant 0 : index
    %c0_17 = arith.constant 0 : index
    %37 = vector.load %arg5[%c0_16, %c0_17] : memref<16x128xf32, #tpu.memory_space<vmem>>, vector<16x128xf32>
    tpu.vector_store %arg5[%c0_16, %c0_17], %36 {strides = array<i32>} : memref<16x128xf32, #tpu.memory_space<vmem>>, vector<16x128xf32>,
    return
  }
  func.func @transform_0(%arg0: i32) -> (i32, i32) {
    %c0_i32 = arith.constant 0 : i32
    %c0_i32_0 = arith.constant 0 : i32
    return %arg0, %c0_i32 : i32, i32
  }
  func.func @transform_1(%arg0: i32) -> (i32, i32) {
    %c0_i32 = arith.constant 0 : i32
    %c0_i32_0 = arith.constant 0 : i32
    %c0_i32_1 = arith.constant 0 : i32
    return %c0_i32, %c0_i32_0 : i32, i32
  }
  func.func @transform_2(%arg0: i32) -> (i32, i32) {
    %c0_i32 = arith.constant 0 : i32
    %c0_i32_0 = arith.constant 0 : i32
    %c0_i32_1 = arith.constant 0 : i32
    return %c0_i32, %c0_i32_0 : i32, i32
  }
  func.func @transform_3(%arg0: i32) -> (i32, i32) {
    %c0_i32 = arith.constant 0 : i32
    %c0_i32_0 = arith.constant 0 : i32
    %c0_i32_1 = arith.constant 0 : i32
    return %c0_i32, %c0_i32_0 : i32, i32
  }
  func.func @transform_4(%arg0: i32) -> (i32, i32) {
    %c0_i32 = arith.constant 0 : i32
    %c0_i32_0 = arith.constant 0 : i32
    return %arg0, %c0_i32 : i32, i32
  }
}

</mosaic_0001>

<bundles_post_ra>
// kernel: tpu_custom_call.1
= control target key start
LH: loop header
LB: loop body
LE: loop exit
PB: predicated region body
PF: predicated region fallthrough
CT: control target
= control target key end

     0   :  { %9 = vsyncpa [#allocation3], 0  ;;  %s405_s0 = inlined_call_operand.hbm [shape: f32[16,32], index: 0, kind: input, shape index: {}]   ;;  %s406_s1 = inlined_call_operand.hbm [shape: f32[32,128], index: 1, kind: input, shape index: {}]   ;;  %s407_s2 = inlined_call_operand.vmem [shape: f32[1,128], index: 2, kind: input, shape index: {}]   ;;  %s408_s3 = inlined_call_operand.vmem [shape: f32[1,128], index: 3, kind: input, shape index: {}]   ;;  %s409_s4 = inlined_call_operand.hbm [shape: f32[16,128], index: 4, kind: output, shape index: {}]  }
   0x1   :  { %10 = vsyncpa [#allocation6], 0 }
   0x2   :  { %11 = vsyncpa [#allocation4], 0  ;;  %s324_s15 = smov [#allocation2]   ;;  %s252_s19 = scalar_lea.hbm %s405_s0, 256 }
   0x3   :  { %s17_s16 = sshll.u32 %s324_s15, 4  ;;  %p253_p0 = scmp.ne.s32.totalorder %s405_s0, %s252_s19  ;;  %s18_s16 = int_to_ptr.vmem [resolvable:$true] %s17_s16 }
   0x4   :  { %p256_p1 = scmp.lt.u32.totalorder %s252_s19, %s405_s0 }
   0x6   :  { %p258_p2 = pnand %p256_p1, %p253_p0 }
   0x8   :  { %261 = shalt.err (!%p258_p2)
}
   0x9   :  { %s262_s24 = scalar_lea.vmem %s18_s16, 256  ;;  %p267_p4 = scmp.lt.s32.totalorder %s18_s16, %s18_s16 }
   0xa   :  { %p263_p3 = scmp.ne.s32.totalorder %s18_s16, %s262_s24  ;;  %p268_p5 = scmp.lt.s32.totalorder %s262_s24, %s262_s24 }
   0xc   :  { %p269_p6 = por %p268_p5, %p267_p4 }
   0xe   :  { %p270_p7 = pnand %p269_p6, %p263_p3 }
  0x10   :  { %273 = shalt.err (!%p270_p7)
}
  0x11   :  { %s325_s25 = smov 128   ;;  %s326_s26 = smov 8  }
  0x12   :  { %23 = dma.hbm_to_vmem [thread:$0]  %s405_s0, 256, %s18_s16, [#allocation3], %s325_s25, %s325_s25, %s326_s26  }
  0x13   :  { %s327_s29 = smov [#allocation5]   ;;  %s274_s7 = scalar_lea.hbm %s406_s1, 512 }
  0x14   :  { %s29_s30 = sshll.u32 %s327_s29, 4  ;;  %p275_p8 = scmp.ne.s32.totalorder %s406_s1, %s274_s7  ;;  %s30_s30 = int_to_ptr.vmem [resolvable:$true] %s29_s30 }
  0x15   :  { %p278_p9 = scmp.lt.u32.totalorder %s274_s7, %s406_s1 }
  0x17   :  { %p280_p10 = pnand %p278_p9, %p275_p8 }
  0x19   :  { %283 = shalt.err (!%p280_p10)
}
  0x1a   :  { %s284_s12 = scalar_lea.vmem %s30_s30, 512  ;;  %p289_p12 = scmp.lt.s32.totalorder %s30_s30, %s30_s30 }
  0x1b   :  { %p285_p11 = scmp.ne.s32.totalorder %s30_s30, %s284_s12  ;;  %p290_p13 = scmp.lt.s32.totalorder %s284_s12, %s284_s12 }
  0x1d   :  { %p291_p0 = por %p290_p13, %p289_p12 }
  0x1f   :  { %p292_p1 = pnand %p291_p0, %p285_p11 }
  0x21   :  { %295 = shalt.err (!%p292_p1)
}
  0x22   :  { %35 = dma.hbm_to_vmem [thread:$0]  %s406_s1, 512, %s30_s30, [#allocation6], %s325_s25, %s325_s25, %s326_s26  }
  0x23   :  { %318 = dma.done.wait [#allocation3], 256  }
  0x24   :  { %319 = vsyncadd [#allocation3], 4294967040 }
  0x25   :  { %320 = dma.done.wait [#allocation6], 512  }
  0x26   :  { %321 = vsyncadd [#allocation6], 4294966784  ;;  %vm52_vm0 = vcmask 261120   ;;  %v48_v0 = vld [vmem:[#allocation5] sm:$0xff]  ;;  %v49_v1 = vld [vmem:[#allocation5 + $0x8] sm:$0xff]  ;;  %s328_s17 = smov [#allocation7]  }
  0x27   :  { %v50_v2 = vld [vmem:[#allocation5 + $0x10] sm:$0xff]  ;;  %v231_v3 = vpack.c.bf16 %v49_v1, %v48_v0  ;;  %v51_v4 = vld [vmem:[#allocation5 + $0x18] sm:$0xff]  ;;  %s197_s18 = sshll.u32 %s328_s17, 4  ;;  %s198_s18 = int_to_ptr.vmem [resolvable:$true] %s197_s18 }
  0x28   :  { %v46_v5 = vld [vmem:[#allocation2] sm:$0xff]  ;;  %v235_v6 = vpack.c.bf16 %v51_v4, %v50_v2  ;;  %v47_v7 = vld [vmem:[#allocation2 + $0x8] sm:$0xff]  ;;  %s296_s19 = scalar_lea.vmem %s198_s18, 256  ;;  %p301_p3 = scmp.lt.s32.totalorder %s198_s18, %s198_s18 }
  0x29   :  { %228 = vmatprep.mubr.msk.f32.mxu0 %vm52_vm0, %v46_v5  ;;  %232 = vmatprep.subr.bf16.mxu0 %v231_v3  ;;  %v212_v40 = vld [vmem:[%s407_s2] ss:$0 sm:$0xff]  ;;  %p297_p2 = scmp.ne.s32.totalorder %s198_s18, %s296_s19  ;;  %p302_p4 = scmp.lt.s32.totalorder %s296_s19, %s296_s19 }
  0x2a   :  { %234 = vmatpush3.bf16.msra.mxu0 %v231_v3  ;;  %v213_v42 = vld [vmem:[%s408_s3] ss:$0 sm:$0xff] }
  0x2b   :  { %236 = vmatprep.subr.bf16.mxu0 %v235_v6  ;;  %p303_p5 = por %p302_p4, %p301_p3 }
  0x2d   :  { %p304_p6 = pnand %p303_p5, %p297_p2 }
  0x2e   :  { %238 = vmatpush3.bf16.msra.mxu0 %v235_v6 }
  0x31   :  { %229 = vmatmul.mubr.msk.f32.vlgmr.msra.gmra.mrb[0].mxu0 %vm52_vm0, %v47_v7 }
 0x104   :  { %v230_v8 = vpop.f32.mrb[0].mxu0 }
 0x105   :  { %v137_v9 = vmul.f32 0.70710677, %v230_v8  ;;  %v125_v10 = vpop.f32.mrb[1].mxu0  ;;  %v135_v17 = vmul.f32 0.5, %v230_v8 }
 0x106   :  { %v136_v11 = vmul.f32 0.70710677, %v125_v10  ;;  %v134_v15 = vmul.f32 0.5, %v125_v10 }
 0x107   :  { %244 = verf.f32 %v137_v9 }
 0x108   :  { %246 = verf.f32 %v136_v11 }
 0x111   :  { %v245_v12 = vpop.eup %244 }
 0x112   :  { %v247_v13 = vpop.eup %246  ;;  %v141_v14 = vadd.f32 1.0, %v245_v12 }
 0x113   :  { %v140_v16 = vadd.f32 1.0, %v247_v13 }
 0x114   :  { %v143_v19 = vmul.f32 %v141_v14, %v135_v17 }
 0x115   :  { %v142_v18 = vmul.f32 %v140_v16, %v134_v15 }
 0x116   :  { %v149_v21 = vmul.f32 %v143_v19, %v143_v19 }
 0x117   :  { %144 = vadd.xlane.f32.xlu0 %v142_v18  ;;  %v148_v20 = vmul.f32 %v142_v18, %v142_v18 }
 0x119   :  { %150 = vadd.xlane.f32.xlu1 %v148_v20 }
 0x11b   :  { %146 = vadd.xlane.f32.xlu0 %v143_v19 }
 0x11d   :  { %152 = vadd.xlane.f32.xlu1 %v149_v21 }
 0x1a4   :  { %v145_v22 = vpop.xlane.xlu0 %144 }
 0x1a5   :  { %v154_v23 = vmul.f32 0.0078125, %v145_v22 }
 0x1a6   :  { %v151_v24 = vpop.xlane.xlu1 %150 }
 0x1a7   :  { %v158_v25 = vmul.f32 %v154_v23, %v154_v23  ;;  %v156_v26 = vmul.f32 0.0078125, %v151_v24  ;;  %v164_v38 = vsub.f32 %v142_v18, %v154_v23 }
 0x1a8   :  { %v147_v27 = vpop.xlane.xlu0 %146 }
 0x1a9   :  { %v160_v28 = vsub.f32 %v156_v26, %v158_v25  ;;  %v155_v29 = vmul.f32 0.0078125, %v147_v27 }
 0x1aa   :  { %v153_v30 = vpop.xlane.xlu1 %152 }
 0x1ab   :  { %v162_v31 = vmax.f32 %v160_v28, 0.0  ;;  %v159_v32 = vmul.f32 %v155_v29, %v155_v29  ;;  %v157_v33 = vmul.f32 0.0078125, %v153_v30  ;;  %v165_v43 = vsub.f32 %v143_v19, %v155_v29 }
 0x1ad   :  { %v166_v34 = vadd.f32 1e-12, %v162_v31  ;;  %v161_v35 = vsub.f32 %v157_v33, %v159_v32 }
 0x1af   :  { %248 = vrsqrt.f32 %v166_v34  ;;  %v163_v36 = vmax.f32 %v161_v35, 0.0 }
 0x1b1   :  { %v167_v37 = vadd.f32 1e-12, %v163_v36 }
 0x1b3   :  { %250 = vrsqrt.f32 %v167_v37 }
 0x1b9   :  { %v249_v39 = vpop.eup %248 }
 0x1ba   :  { %v170_v41 = vmul.f32 %v249_v39, %v164_v38 }
 0x1bc   :  { %v179_v44 = vmul.f32 %v212_v40, %v170_v41 }
 0x1bd   :  { %v251_v45 = vpop.eup %250 }
 0x1be   :  { %v171_v46 = vmul.f32 %v251_v45, %v165_v43  ;;  %v188_v47 = vadd.f32 %v213_v42, %v179_v44 }
 0x1c0   :  { %v180_v48 = vmul.f32 %v212_v40, %v171_v46  ;;  %190 = vst [vmem:[#allocation7] sm:$0xff] %v188_v47 }
 0x1c2   :  { %v189_v49 = vadd.f32 %v213_v42, %v180_v48 }
 0x1c4   :  { %191 = vst [vmem:[#allocation7 + $0x8] sm:$0xff] %v189_v49 }
 0x1c5   :  { %307 = shalt.err (!%p304_p6)
}
 0x1c6   :  { %s308_s20 = scalar_lea.hbm %s409_s4, 256 }
 0x1c7   :  { %p309_p7 = scmp.ne.s32.totalorder %s409_s4, %s308_s20  ;;  %p312_p8 = scmp.lt.u32.totalorder %s308_s20, %s409_s4 }
 0x1c9   :  { %p314_p9 = pnand %p312_p8, %p309_p7 }
 0x1cb   :  { %317 = shalt.err (!%p314_p9)
}
 0x1cc   :  { %203 = dma.vmem_to_hbm [thread:$0]  %s198_s18, 256, %s409_s4, [#allocation4], %s325_s25, %s325_s25, %s326_s26  }
 0x1cd   :  { %322 = dma.done.wait [#allocation4], 256  }
 0x1ce   :  { %323 = vsyncadd [#allocation4], 4294967040 }
 0x1cf   :  { %207 = vsyncpa [#allocation3], 1 }
 0x1d0   :  { %208 = vsyncpa [#allocation6], 1 }
 0x1d1   :  { %209 = vsyncpa [#allocation4], 1 }

// kernel: tpu_custom_call.1
= control target key start
LH: loop header
LB: loop body
LE: loop exit
PB: predicated region body
PF: predicated region fallthrough
CT: control target
= control target key end

     0   :  { %9 = vsyncpa [#allocation3], 0  ;;  %s405_s0 = inlined_call_operand.hbm [shape: f32[16,32], index: 0, kind: input, shape index: {}]   ;;  %s406_s1 = inlined_call_operand.hbm [shape: f32[32,128], index: 1, kind: input, shape index: {}]   ;;  %s407_s2 = inlined_call_operand.vmem [shape: f32[1,128], index: 2, kind: input, shape index: {}]   ;;  %s408_s3 = inlined_call_operand.vmem [shape: f32[1,128], index: 3, kind: input, shape index: {}]   ;;  %s409_s4 = inlined_call_operand.hbm [shape: f32[16,128], index: 4, kind: output, shape index: {}]  }
   0x1   :  { %10 = vsyncpa [#allocation6], 0 }
   0x2   :  { %11 = vsyncpa [#allocation4], 0  ;;  %s324_s15 = smov [#allocation2]   ;;  %s252_s19 = scalar_lea.hbm %s405_s0, 256 }
   0x3   :  { %s17_s16 = sshll.u32 %s324_s15, 4  ;;  %p253_p0 = scmp.ne.s32.totalorder %s405_s0, %s252_s19  ;;  %s18_s16 = int_to_ptr.vmem [resolvable:$true] %s17_s16 }
   0x4   :  { %p256_p1 = scmp.lt.u32.totalorder %s252_s19, %s405_s0 }
   0x6   :  { %p258_p2 = pnand %p256_p1, %p253_p0 }
   0x8   :  { %261 = shalt.err (!%p258_p2)
}
   0x9   :  { %s262_s24 = scalar_lea.vmem %s18_s16, 256  ;;  %p267_p4 = scmp.lt.s32.totalorder %s18_s16, %s18_s16 }
   0xa   :  { %p263_p3 = scmp.ne.s32.totalorder %s18_s16, %s262_s24  ;;  %p268_p5 = scmp.lt.s32.totalorder %s262_s24, %s262_s24 }
   0xc   :  { %p269_p6 = por %p268_p5, %p267_p4 }
   0xe   :  { %p270_p7 = pnand %p269_p6, %p263_p3 }
  0x10   :  { %273 = shalt.err (!%p270_p7)
}
  0x11   :  { %s325_s25 = smov 128   ;;  %s326_s26 = smov 8  }
  0x12   :  { %23 = dma.hbm_to_vmem [thread:$0]  %s405_s0, 256, %s18_s16, [#allocation3], %s325_s25, %s325_s25, %s326_s26  }
  0x13   :  { %s327_s29 = smov [#allocation5]   ;;  %s274_s7 = scalar_lea.hbm %s406_s1, 512 }
  0x14   :  { %s29_s30 = sshll.u32 %s327_s29, 4  ;;  %p275_p8 = scmp.ne.s32.totalorder %s406_s1, %s274_s7  ;;  %s30_s30 = int_to_ptr.vmem [resolvable:$true] %s29_s30 }
  0x15   :  { %p278_p9 = scmp.lt.u32.totalorder %s274_s7, %s406_s1 }
  0x17   :  { %p280_p10 = pnand %p278_p9, %p275_p8 }
  0x19   :  { %283 = shalt.err (!%p280_p10)
}
  0x1a   :  { %s284_s12 = scalar_lea.vmem %s30_s30, 512  ;;  %p289_p12 = scmp.lt.s32.totalorder %s30_s30, %s30_s30 }
  0x1b   :  { %p285_p11 = scmp.ne.s32.totalorder %s30_s30, %s284_s12  ;;  %p290_p13 = scmp.lt.s32.totalorder %s284_s12, %s284_s12 }
  0x1d   :  { %p291_p0 = por %p290_p13, %p289_p12 }
  0x1f   :  { %p292_p1 = pnand %p291_p0, %p285_p11 }
  0x21   :  { %295 = shalt.err (!%p292_p1)
}
  0x22   :  { %35 = dma.hbm_to_vmem [thread:$0]  %s406_s1, 512, %s30_s30, [#allocation6], %s325_s25, %s325_s25, %s326_s26  }
  0x23   :  { %318 = dma.done.wait [#allocation3], 256  }
  0x24   :  { %319 = vsyncadd [#allocation3], 4294967040 }
  0x25   :  { %320 = dma.done.wait [#allocation6], 512  }
  0x26   :  { %321 = vsyncadd [#allocation6], 4294966784  ;;  %vm52_vm0 = vcmask 261120   ;;  %v48_v0 = vld [vmem:[#allocation5] sm:$0xff]  ;;  %v49_v1 = vld [vmem:[#allocation5 + $0x8] sm:$0xff]  ;;  %s328_s17 = smov [#allocation7]  }
  0x27   :  { %v50_v2 = vld [vmem:[#allocation5 + $0x10] sm:$0xff]  ;;  %v231_v3 = vpack.c.bf16 %v49_v1, %v48_v0  ;;  %v51_v4 = vld [vmem:[#allocation5 + $0x18] sm:$0xff]  ;;  %s197_s18 = sshll.u32 %s328_s17, 4  ;;  %s198_s18 = int_to_ptr.vmem [resolvable:$true] %s197_s18 }
  0x28   :  { %v46_v5 = vld [vmem:[#allocation2] sm:$0xff]  ;;  %v235_v6 = vpack.c.bf16 %v51_v4, %v50_v2  ;;  %v47_v7 = vld [vmem:[#allocation2 + $0x8] sm:$0xff]  ;;  %s296_s19 = scalar_lea.vmem %s198_s18, 256  ;;  %p301_p3 = scmp.lt.s32.totalorder %s198_s18, %s198_s18 }
  0x29   :  { %228 = vmatprep.mubr.msk.f32.mxu0 %vm52_vm0, %v46_v5  ;;  %232 = vmatprep.subr.bf16.mxu0 %v231_v3  ;;  %v212_v40 = vld [vmem:[%s407_s2] ss:$0 sm:$0xff]  ;;  %p297_p2 = scmp.ne.s32.totalorder %s198_s18, %s296_s19  ;;  %p302_p4 = scmp.lt.s32.totalorder %s296_s19, %s296_s19 }
  0x2a   :  { %234 = vmatpush3.bf16.msra.mxu0 %v231_v3  ;;  %v213_v42 = vld [vmem:[%s408_s3] ss:$0 sm:$0xff] }
  0x2b   :  { %236 = vmatprep.subr.bf16.mxu0 %v235_v6  ;;  %p303_p5 = por %p302_p4, %p301_p3 }
  0x2d   :  { %p304_p6 = pnand %p303_p5, %p297_p2 }
  0x2e   :  { %238 = vmatpush3.bf16.msra.mxu0 %v235_v6 }
  0x31   :  { %229 = vmatmul.mubr.msk.f32.vlgmr.msra.gmra.mrb[0].mxu0 %vm52_vm0, %v47_v7 }
 0x104   :  { %v230_v8 = vpop.f32.mrb[0].mxu0 }
 0x105   :  { %v137_v9 = vmul.f32 0.70710677, %v230_v8  ;;  %v125_v10 = vpop.f32.mrb[1].mxu0  ;;  %v135_v17 = vmul.f32 0.5, %v230_v8 }
 0x106   :  { %v136_v11 = vmul.f32 0.70710677, %v125_v10  ;;  %v134_v15 = vmul.f32 0.5, %v125_v10 }
 0x107   :  { %244 = verf.f32 %v137_v9 }
 0x108   :  { %246 = verf.f32 %v136_v11 }
 0x111   :  { %v245_v12 = vpop.eup %244 }
 0x112   :  { %v247_v13 = vpop.eup %246  ;;  %v141_v14 = vadd.f32 1.0, %v245_v12 }
 0x113   :  { %v140_v16 = vadd.f32 1.0, %v247_v13 }
 0x114   :  { %v143_v19 = vmul.f32 %v141_v14, %v135_v17 }
 0x115   :  { %v142_v18 = vmul.f32 %v140_v16, %v134_v15 }
 0x116   :  { %v149_v21 = vmul.f32 %v143_v19, %v143_v19 }
 0x117   :  { %144 = vadd.xlane.f32.xlu0 %v142_v18  ;;  %v148_v20 = vmul.f32 %v142_v18, %v142_v18 }
 0x119   :  { %150 = vadd.xlane.f32.xlu1 %v148_v20 }
 0x11b   :  { %146 = vadd.xlane.f32.xlu0 %v143_v19 }
 0x11d   :  { %152 = vadd.xlane.f32.xlu1 %v149_v21 }
 0x1a4   :  { %v145_v22 = vpop.xlane.xlu0 %144 }
 0x1a5   :  { %v154_v23 = vmul.f32 0.0078125, %v145_v22 }
 0x1a6   :  { %v151_v24 = vpop.xlane.xlu1 %150 }
 0x1a7   :  { %v158_v25 = vmul.f32 %v154_v23, %v154_v23  ;;  %v156_v26 = vmul.f32 0.0078125, %v151_v24  ;;  %v164_v38 = vsub.f32 %v142_v18, %v154_v23 }
 0x1a8   :  { %v147_v27 = vpop.xlane.xlu0 %146 }
 0x1a9   :  { %v160_v28 = vsub.f32 %v156_v26, %v158_v25  ;;  %v155_v29 = vmul.f32 0.0078125, %v147_v27 }
 0x1aa   :  { %v153_v30 = vpop.xlane.xlu1 %152 }
 0x1ab   :  { %v162_v31 = vmax.f32 %v160_v28, 0.0  ;;  %v159_v32 = vmul.f32 %v155_v29, %v155_v29  ;;  %v157_v33 = vmul.f32 0.0078125, %v153_v30  ;;  %v165_v43 = vsub.f32 %v143_v19, %v155_v29 }
 0x1ad   :  { %v166_v34 = vadd.f32 1e-12, %v162_v31  ;;  %v161_v35 = vsub.f32 %v157_v33, %v159_v32 }
 0x1af   :  { %248 = vrsqrt.f32 %v166_v34  ;;  %v163_v36 = vmax.f32 %v161_v35, 0.0 }
 0x1b1   :  { %v167_v37 = vadd.f32 1e-12, %v163_v36 }
 0x1b3   :  { %250 = vrsqrt.f32 %v167_v37 }
 0x1b9   :  { %v249_v39 = vpop.eup %248 }
 0x1ba   :  { %v170_v41 = vmul.f32 %v249_v39, %v164_v38 }
 0x1bc   :  { %v179_v44 = vmul.f32 %v212_v40, %v170_v41 }
 0x1bd   :  { %v251_v45 = vpop.eup %250 }
 0x1be   :  { %v171_v46 = vmul.f32 %v251_v45, %v165_v43  ;;  %v188_v47 = vadd.f32 %v213_v42, %v179_v44 }
 0x1c0   :  { %v180_v48 = vmul.f32 %v212_v40, %v171_v46  ;;  %190 = vst [vmem:[#allocation7] sm:$0xff] %v188_v47 }
 0x1c2   :  { %v189_v49 = vadd.f32 %v213_v42, %v180_v48 }
 0x1c4   :  { %191 = vst [vmem:[#allocation7 + $0x8] sm:$0xff] %v189_v49 }
 0x1c5   :  { %307 = shalt.err (!%p304_p6)
}
 0x1c6   :  { %s308_s20 = scalar_lea.hbm %s409_s4, 256 }
 0x1c7   :  { %p309_p7 = scmp.ne.s32.totalorder %s409_s4, %s308_s20  ;;  %p312_p8 = scmp.lt.u32.totalorder %s308_s20, %s409_s4 }
 0x1c9   :  { %p314_p9 = pnand %p312_p8, %p309_p7 }
 0x1cb   :  { %317 = shalt.err (!%p314_p9)
}
 0x1cc   :  { %203 = dma.vmem_to_hbm [thread:$0]  %s198_s18, 256, %s409_s4, [#allocation4], %s325_s25, %s325_s25, %s326_s26  }
 0x1cd   :  { %322 = dma.done.wait [#allocation4], 256  }
 0x1ce   :  { %323 = vsyncadd [#allocation4], 4294967040 }
 0x1cf   :  { %207 = vsyncpa [#allocation3], 1 }
 0x1d0   :  { %208 = vsyncpa [#allocation6], 1 }
 0x1d1   :  { %209 = vsyncpa [#allocation4], 1 }

</bundles_post_ra>
